<compile_context>
chip_gen: v6e
topology: v6e:2x2x1
jax: 0.10.0
libtpu: 0.0.40
codegen_flags: <defaults>
</compile_context>

<pallas_src>
import math

import jax
import jax.numpy as jnp
from jax import lax
from jax.experimental import pallas as pl
from jax.experimental.pallas import tpu as pltpu


def _round_up(x, m):
    return ((x + m - 1) // m) * m


def _stochastic_linear_kernel(x_ref, mu_ref, logvar_ref, xi_ref, b_ref,
                              o_ref, acc_ref):
    """Grid = (O-tiles, B-tiles, K-tiles); K (contraction) is innermost."""
    k = pl.program_id(2)

    @pl.when(k == 0)
    def _():
        acc_ref[...] = jnp.zeros_like(acc_ref)

    # Reparameterized weight sample (VPU + EUP), kept in f32.
    # (Folding the 0.5 into stored logvar would save one vmul/elem on v5e, but
    #  we keep the module's parameter convention.)
    w = mu_ref[...] + jnp.exp(0.5 * logvar_ref[...]) * xi_ref[...]      # (tO, tK)

    # x (tB, tK) . W (tO, tK), contracting over the last dim of both ->
    # (tB, tO) on the MXU, f32 accumulation, no explicit w.T relayout.
    acc_ref[...] += lax.dot_general(
        x_ref[...], w,
        dimension_numbers=(((1,), (1,)), ((), ())),
        preferred_element_type=jnp.float32)

    @pl.when(k == pl.num_programs(2) - 1)
    def _():
        # Bias added exactly once, on the final K step.
        o_ref[...] = (acc_ref[...] + b_ref[...]).astype(o_ref.dtype)


def stochastic_linear(x, mu, logvar, xi, b_mu, b_logvar, b_xi,
                      *, tb_cap=256, to_cap=512, tk_cap=1024):
    """Pallas forward of StochasticLayer with a linear `operation`.

    x: (B, in_features); mu/logvar/xi: (out_features, in_features);
    b_*: (out_features,). Returns (B, out_features) float32.
    Tile caps keep the double-buffered footprint well under v7x's 64 MiB VMEM.
    """
    x = x.astype(jnp.float32)
    mu = mu.astype(jnp.float32)
    logvar = logvar.astype(jnp.float32)
    xi = xi.astype(jnp.float32)

    B, K = x.shape
    O, K2 = mu.shape
    assert K == K2, (K, K2)

    # Sample the bias in plain JAX (O(out_features) work) -> single small input.
    b = (b_mu.astype(jnp.float32)
         + jnp.exp(0.5 * b_logvar.astype(jnp.float32)) * b_xi.astype(jnp.float32))
    b = b.reshape(1, O)

    # Tile sizes: lane-dense output (tO multiple of 128), (8,128)/MXU aligned.
    tB = min(_round_up(B, 8), tb_cap)
    tO = min(_round_up(O, 128), to_cap)
    tK = min(_round_up(K, 128), tk_cap)

    Bp = _round_up(B, tB)
    Op = _round_up(O, tO)
    Kp = _round_up(K, tK)

    # Zero-pad to tile multiples. Padded K columns are 0 in both x and the
    # sampled weight (mu=0, xi=0 -> W=0), so they contribute nothing; padded
    # O rows are sliced off below.
    x_p = jnp.pad(x, ((0, Bp - B), (0, Kp - K)))
    mu_p = jnp.pad(mu, ((0, Op - O), (0, Kp - K)))
    logvar_p = jnp.pad(logvar, ((0, Op - O), (0, Kp - K)))
    xi_p = jnp.pad(xi, ((0, Op - O), (0, Kp - K)))
    b_p = jnp.pad(b, ((0, 0), (0, Op - O)))

    grid = (Op // tO, Bp // tB, Kp // tK)

    out_p = pl.pallas_call(
        _stochastic_linear_kernel,
        out_shape=jax.ShapeDtypeStruct((Bp, Op), jnp.float32),
        grid_spec=pltpu.PrefetchScalarGridSpec(
            num_scalar_prefetch=0,
            grid=grid,
            in_specs=[
                pl.BlockSpec((tB, tK), lambda o, b, k: (b, k)),   # x
                pl.BlockSpec((tO, tK), lambda o, b, k: (o, k)),   # mu
                pl.BlockSpec((tO, tK), lambda o, b, k: (o, k)),   # logvar
                pl.BlockSpec((tO, tK), lambda o, b, k: (o, k)),   # xi
                pl.BlockSpec((1, tO), lambda o, b, k: (0, o)),    # sampled bias
            ],
            out_specs=pl.BlockSpec((tB, tO), lambda o, b, k: (b, o)),
            scratch_shapes=[pltpu.VMEM((tB, tO), jnp.float32)],
        ),
        compiler_params=pltpu.CompilerParams(
            dimension_semantics=("parallel", "parallel", "arbitrary"),
            vmem_limit_bytes=32 * 1024 * 1024,
        ),
    )(x_p, mu_p, logvar_p, xi_p, b_p)

    return out_p[:B, :O]


def _reference(x, mu, logvar, xi, b_mu, b_logvar, b_xi):
    w = mu + jnp.exp(0.5 * logvar) * xi
    b = b_mu + jnp.exp(0.5 * b_logvar) * b_xi
    return x @ w.T + b


def _make_inputs(key, batch, in_features, out_features):
    k_x, k_mu, k_bmu, k_xi, k_bxi = jax.random.split(key, 5)
    # __init__ / init_mu / init_logvar (deterministic, in-script):
    stdev = math.sqrt(1.0 / in_features)
    mu = jax.random.uniform(k_mu, (out_features, in_features),
                            minval=-stdev, maxval=stdev, dtype=jnp.float32)
    logvar = jnp.zeros((out_features, in_features), jnp.float32)
    b_mu = jax.random.uniform(k_bmu, (out_features,),
                              minval=-stdev, maxval=stdev, dtype=jnp.float32)
    b_logvar = jnp.zeros((out_features,), jnp.float32)
    # init_xi(): xi ~ N(0, 1)
    xi = jax.random.normal(k_xi, (out_features, in_features), jnp.float32)
    b_xi = jax.random.normal(k_bxi, (out_features,), jnp.float32)
    x = jax.random.normal(k_x, (batch, in_features), jnp.float32)
    return x, mu, logvar, xi, b_mu, b_logvar, b_xi


if __name__ == "__main__":
    key = jax.random.PRNGKey(0)
    k1, k2 = jax.random.split(key)

    # 1) Small shapes consistent with the module: weights_size = (out, in).
    args = _make_inputs(k1, batch=8, in_features=32, out_features=16)
    out = jax.block_until_ready(stochastic_linear(*args))
    ref = _reference(*args)
    assert out.shape == (8, 16)
    assert jnp.allclose(out, ref, atol=1e-5, rtol=1e-5)

    # 2) Multi-tile grid path (accumulation over K, finalize bias-add, weight
    #    reuse across batch tiles) exercised via small tile caps.
    args2 = _make_inputs(k2, batch=16, in_features=256, out_features=256)
    out2 = jax.block_until_ready(
        stochastic_linear(*args2, tb_cap=8, to_cap=128, tk_cap=128))
    ref2 = _reference(*args2)
    assert out2.shape == (16, 256)
    assert jnp.allclose(out2, ref2, atol=1e-4, rtol=1e-4)

    print("KERNEL_OK")
</pallas_src>

<mosaic_0001>
module attributes {stable_mosaic.version = 11 : i64} {
  func.func @_stochastic_linear_kernel(%arg0: i32, %arg1: i32, %arg2: i32, %arg3: memref<8x128xf32, #tpu.memory_space<vmem>>, %arg4: memref<128x128xf32, #tpu.memory_space<vmem>>, %arg5: memref<128x128xf32, #tpu.memory_space<vmem>>, %arg6: memref<128x128xf32, #tpu.memory_space<vmem>>, %arg7: memref<1x128xf32, #tpu.memory_space<vmem>>, %arg8: memref<8x128xf32, #tpu.memory_space<vmem>>, %arg9: memref<8x128xf32, #tpu.memory_space<vmem>>) attributes {dimension_semantics = [#tpu.dimension_semantics<parallel>, #tpu.dimension_semantics<parallel>, #tpu.dimension_semantics<arbitrary>], iteration_bounds = array<i64: 1, 1, 1>, scalar_prefetch = 0 : i64, scratch_operands = 1 : i64, tpu.core_type = #tpu.core_type<tc>, window_params = [{transform_indices = @transform_0, window_bounds = array<i64: 8, 128>}, {transform_indices = @transform_1, window_bounds = array<i64: 128, 128>}, {transform_indices = @transform_2, window_bounds = array<i64: 128, 128>}, {transform_indices = @transform_3, window_bounds = array<i64: 128, 128>}, {transform_indices = @transform_4, window_bounds = array<i64: 1, 128>}, {transform_indices = @transform_5, window_bounds = array<i64: 8, 128>}]} {
    %c0_i32 = arith.constant 0 : i32
    %0 = arith.cmpi eq, %arg2, %c0_i32 : i32
    %1 = arith.extui %0 : i1 to i32
    %c0_i32_0 = arith.constant 0 : i32
    %2 = arith.cmpi ne, %1, %c0_i32_0 : i32
    scf.if %2 {
      %cst_15 = arith.constant 0.000000e+00 : f32
      %19 = vector.broadcast %cst_15 : f32 to vector<8x128xf32>
      %c0_16 = arith.constant 0 : index
      %c0_17 = arith.constant 0 : index
      %20 = vector.load %arg9[%c0_16, %c0_17] : memref<8x128xf32, #tpu.memory_space<vmem>>, vector<8x128xf32>
      tpu.vector_store %arg9[%c0_16, %c0_17], %19 {strides = array<i32>} : memref<8x128xf32, #tpu.memory_space<vmem>>, vector<8x128xf32>,
    } else {
    }
    %c0 = arith.constant 0 : index
    %c0_1 = arith.constant 0 : index
    %3 = vector.load %arg4[%c0, %c0_1] : memref<128x128xf32, #tpu.memory_space<vmem>>, vector<128x128xf32>
    %c0_2 = arith.constant 0 : index
    %c0_3 = arith.constant 0 : index
    %4 = vector.load %arg5[%c0_2, %c0_3] : memref<128x128xf32, #tpu.memory_space<vmem>>, vector<128x128xf32>
    %cst = arith.constant 5.000000e-01 : f32
    %5 = vector.broadcast %cst : f32 to vector<128x128xf32>
    %6 = arith.mulf %5, %4 : vector<128x128xf32>
    %7 = math.exp %6 : vector<128x128xf32>
    %c0_4 = arith.constant 0 : index
    %c0_5 = arith.constant 0 : index
    %8 = vector.load %arg6[%c0_4, %c0_5] : memref<128x128xf32, #tpu.memory_space<vmem>>, vector<128x128xf32>
    %9 = arith.mulf %7, %8 : vector<128x128xf32>
    %10 = arith.addf %3, %9 : vector<128x128xf32>
    %c0_6 = arith.constant 0 : index
    %c0_7 = arith.constant 0 : index
    %11 = vector.load %arg9[%c0_6, %c0_7] : memref<8x128xf32, #tpu.memory_space<vmem>>, vector<8x128xf32>
    %c0_8 = arith.constant 0 : index
    %c0_9 = arith.constant 0 : index
    %12 = vector.load %arg3[%c0_8, %c0_9] : memref<8x128xf32, #tpu.memory_space<vmem>>, vector<8x128xf32>
    %cst_10 = arith.constant dense<0.000000e+00> : vector<8x128xf32>
    %13 = tpu.matmul %12, %10, %cst_10 {dimension_numbers = #tpu.dot_dimension_numbers<[1], [1], [0], [0], [0, 0, 1, 0], [], []>} : vector<8x128xf32>, vector<128x128xf32>, vector<8x128xf32> -> vector<8x128xf32>
    %14 = arith.addf %11, %13 : vector<8x128xf32>
    %c0_11 = arith.constant 0 : index
    %c0_12 = arith.constant 0 : index
    %15 = vector.load %arg9[%c0_11, %c0_12] : memref<8x128xf32, #tpu.memory_space<vmem>>, vector<8x128xf32>
    tpu.vector_store %arg9[%c0_11, %c0_12], %14 {strides = array<i32>} : memref<8x128xf32, #tpu.memory_space<vmem>>, vector<8x128xf32>,
    %c0_i32_13 = arith.constant 0 : i32
    %16 = arith.cmpi eq, %arg2, %c0_i32_13 : i32
    %17 = arith.extui %16 : i1 to i32
    %c0_i32_14 = arith.constant 0 : i32
    %18 = arith.cmpi ne, %17, %c0_i32_14 : i32
    scf.if %18 {
      %c0_15 = arith.constant 0 : index
      %c0_16 = arith.constant 0 : index
      %19 = vector.load %arg9[%c0_15, %c0_16] : memref<8x128xf32, #tpu.memory_space<vmem>>, vector<8x128xf32>
      %c0_17 = arith.constant 0 : index
      %c0_18 = arith.constant 0 : index
      %20 = vector.load %arg7[%c0_17, %c0_18] : memref<1x128xf32, #tpu.memory_space<vmem>>, vector<1x128xf32>
      %21 = vector.broadcast %20 : vector<1x128xf32> to vector<8x128xf32>
      %22 = arith.addf %19, %21 : vector<8x128xf32>
      %c0_19 = arith.constant 0 : index
      %c0_20 = arith.constant 0 : index
      %23 = vector.load %arg8[%c0_19, %c0_20] : memref<8x128xf32, #tpu.memory_space<vmem>>, vector<8x128xf32>
      tpu.vector_store %arg8[%c0_19, %c0_20], %22 {strides = array<i32>} : memref<8x128xf32, #tpu.memory_space<vmem>>, vector<8x128xf32>,
    } else {
    }
    return
  }
  func.func @transform_0(%arg0: i32, %arg1: i32, %arg2: i32) -> (i32, i32) {
    %c0_i32 = arith.constant 0 : i32
    return %arg1, %arg2 : i32, i32
  }
  func.func @transform_1(%arg0: i32, %arg1: i32, %arg2: i32) -> (i32, i32) {
    %c0_i32 = arith.constant 0 : i32
    return %arg0, %arg2 : i32, i32
  }
  func.func @transform_2(%arg0: i32, %arg1: i32, %arg2: i32) -> (i32, i32) {
    %c0_i32 = arith.constant 0 : i32
    return %arg0, %arg2 : i32, i32
  }
  func.func @transform_3(%arg0: i32, %arg1: i32, %arg2: i32) -> (i32, i32) {
    %c0_i32 = arith.constant 0 : i32
    return %arg0, %arg2 : i32, i32
  }
  func.func @transform_4(%arg0: i32, %arg1: i32, %arg2: i32) -> (i32, i32) {
    %c0_i32 = arith.constant 0 : i32
    %c0_i32_0 = arith.constant 0 : i32
    return %c0_i32, %arg0 : i32, i32
  }
  func.func @transform_5(%arg0: i32, %arg1: i32, %arg2: i32) -> (i32, i32) {
    %c0_i32 = arith.constant 0 : i32
    return %arg1, %arg0 : i32, i32
  }
}

</mosaic_0001>

<bundles_post_ra>
// kernel: tpu_custom_call.1
= control target key start
LH: loop header
LB: loop body
LE: loop exit
PB: predicated region body
PF: predicated region fallthrough
CT: control target
= control target key end

     0   :  { %10 = vsyncpa [#allocation4], 0  ;;  %s596_s0 = inlined_call_operand.hbm [shape: f32[8,128], index: 0, kind: input, shape index: {}]   ;;  %s597_s1 = inlined_call_operand.hbm [shape: f32[128,128], index: 1, kind: input, shape index: {}]   ;;  %s598_s2 = inlined_call_operand.hbm [shape: f32[128,128], index: 2, kind: input, shape index: {}]   ;;  %s599_s3 = inlined_call_operand.hbm [shape: f32[128,128], index: 3, kind: input, shape index: {}]   ;;  %s600_s4 = inlined_call_operand.vmem [shape: f32[1,128], index: 4, kind: input, shape index: {}]   ;;  %s601_s5 = inlined_call_operand.hbm [shape: f32[8,128], index: 5, kind: output, shape index: {}]  }
   0x1   :  { %11 = vsyncpa [#allocation7], 0 }
   0x2   :  { %12 = vsyncpa [#allocation10], 0 }
   0x3   :  { %13 = vsyncpa [#allocation5], 0  ;;  %s513_s18 = smov [#allocation6]  }
   0x4   :  { %s29_s19 = sshll.u32 %s513_s18, 4  ;;  %s30_s19 = int_to_ptr.vmem [resolvable:$true] %s29_s19 }
   0x5   :  { %s413_s20 = scalar_lea.vmem %s30_s19, 2048  ;;  %p418_p1 = scmp.lt.s32.totalorder %s30_s19, %s30_s19 }
   0x6   :  { %p414_p0 = scmp.ne.s32.totalorder %s30_s19, %s413_s20  ;;  %p419_p2 = scmp.lt.s32.totalorder %s413_s20, %s413_s20 }
   0x8   :  { %p420_p3 = por %p419_p2, %p418_p1 }
   0xa   :  { %p421_p4 = pnand %p420_p3, %p414_p0 }
   0xc   :  { %424 = shalt.err (!%p421_p4)
}
   0xd   :  { %s514_s21 = smov 128   ;;  %s515_s22 = smov 8  }
   0xe   :  { %35 = dma.hbm_to_vmem [thread:$0]  %s597_s1, 2048, %s30_s19, [#allocation7], %s514_s21, %s514_s21, %s515_s22  }
   0xf   :  { %s516_s25 = smov [#allocation3]   ;;  %s517_s27 = smov [#allocation8]  }
  0x10   :  { %s20_s26 = sshll.u32 %s516_s25, 4  ;;  %s41_s28 = sshll.u32 %s517_s27, 4  ;;  %s21_s26 = int_to_ptr.vmem [resolvable:$true] %s20_s26  ;;  %s42_s28 = int_to_ptr.vmem [resolvable:$true] %s41_s28 }
  0x11   :  { %s433_s29 = scalar_lea.vmem %s21_s26, 128  ;;  %p438_p6 = scmp.lt.s32.totalorder %s21_s26, %s21_s26 }
  0x12   :  { %p434_p5 = scmp.ne.s32.totalorder %s21_s26, %s433_s29  ;;  %p439_p7 = scmp.lt.s32.totalorder %s433_s29, %s433_s29 }
  0x14   :  { %p440_p8 = por %p439_p7, %p438_p6 }
  0x16   :  { %p441_p9 = pnand %p440_p8, %p434_p5 }
  0x18   :  { %444 = shalt.err (!%p441_p9)
}
  0x19   :  { %23 = dma.hbm_to_vmem [thread:$0]  %s596_s0, 128, %s21_s26, [#allocation4]  }
  0x1a   :  { %s453_s7 = scalar_lea.vmem %s42_s28, 2048  ;;  %p458_p11 = scmp.lt.s32.totalorder %s42_s28, %s42_s28 }
  0x1b   :  { %p454_p10 = scmp.ne.s32.totalorder %s42_s28, %s453_s7  ;;  %p459_p12 = scmp.lt.s32.totalorder %s453_s7, %s453_s7 }
  0x1d   :  { %p460_p13 = por %p459_p12, %p458_p11 }
  0x1f   :  { %p461_p0 = pnand %p460_p13, %p454_p10 }
  0x21   :  { %464 = shalt.err (!%p461_p0)
}
  0x22   :  { %47 = dma.hbm_to_vmem [thread:$0]  %s598_s2, 2048, %s42_s28, [#allocation7], %s514_s21, %s514_s21, %s515_s22  }
  0x23   :  { %s518_s9 = smov [#allocation9]  }
  0x24   :  { %s53_s10 = sshll.u32 %s518_s9, 4  ;;  %s54_s10 = int_to_ptr.vmem [resolvable:$true] %s53_s10 }
  0x25   :  { %s473_s11 = scalar_lea.vmem %s54_s10, 2048  ;;  %p478_p2 = scmp.lt.s32.totalorder %s54_s10, %s54_s10 }
  0x26   :  { %p474_p1 = scmp.ne.s32.totalorder %s54_s10, %s473_s11  ;;  %p479_p3 = scmp.lt.s32.totalorder %s473_s11, %s473_s11 }
  0x28   :  { %p480_p4 = por %p479_p3, %p478_p2 }
  0x2a   :  { %p481_p5 = pnand %p480_p4, %p474_p1 }
  0x2c   :  { %484 = shalt.err (!%p481_p5)
}
  0x2d   :  { %59 = dma.hbm_to_vmem [thread:$0]  %s599_s3, 2048, %s54_s10, [#allocation10], %s514_s21, %s514_s21, %s515_s22  }
  0x2e   :  { %505 = dma.done.wait [#allocation4], 128  }
  0x2f   :  { %506 = vsyncadd [#allocation4], 4294967168 }
  0x30   :  { %507 = dma.done.wait [#allocation7], 4096  }
  0x31   :  { %508 = vsyncadd [#allocation7], 4294963200 }
  0x32   :  { %509 = dma.done.wait [#allocation10], 2048  }
  0x33   :  { %510 = vsyncadd [#allocation10], 4294965248  ;;  %v519_v0 = vmov 0.0   ;;  %vm520_vm0 = vmmov 0   ;;  %v110_v1 = vld [vmem:[#allocation8 + $0x78] sm:$0xff]  ;;  %v109_v3 = vld [vmem:[#allocation8 + $0x70] sm:$0xff] }
  0x34   :  { %329 = vmatprep.subr.mxu0 %v519_v0  ;;  %361 = vmatprep.mubr.msk.f32.mxu0 %vm520_vm0, %v519_v0  ;;  %v126_v2 = vmul.f32 0.5, %v110_v1  ;;  %v125_v4 = vmul.f32 0.5, %v109_v3  ;;  %v108_v5 = vld [vmem:[#allocation8 + $0x68] sm:$0xff]  ;;  %v107_v8 = vld [vmem:[#allocation8 + $0x60] sm:$0xff]  ;;  %v106_v11 = vld [vmem:[#allocation8 + $0x58] sm:$0xff]  ;;  %s521_s13 = smov [#allocation11]  }
  0x35   :  { %v124_v7 = vmul.f32 0.5, %v108_v5  ;;  %v123_v10 = vmul.f32 0.5, %v107_v8  ;;  %v122_v14 = vmul.f32 0.5, %v106_v11  ;;  %v105_v15 = vld [vmem:[#allocation8 + $0x50] sm:$0xff]  ;;  %v104_v18 = vld [vmem:[#allocation8 + $0x48] sm:$0xff]  ;;  %v174_v21 = vld [vmem:[#allocation9 + $0x78] sm:$0xff] }
  0x36   :  { %v157_v6 = vmul.f32 1.442695, %v126_v2  ;;  %v155_v9 = vmul.f32 1.442695, %v125_v4  ;;  %v121_v17 = vmul.f32 0.5, %v105_v15  ;;  %v120_v20 = vmul.f32 0.5, %v104_v18 }
  0x37   :  { %v153_v12 = vmul.f32 1.442695, %v124_v7  ;;  %v151_v13 = vmul.f32 1.442695, %v123_v10  ;;  %v149_v16 = vmul.f32 1.442695, %v122_v14 }
  0x38   :  { %373 = vpow2.f32 %v157_v6  ;;  %v147_v19 = vmul.f32 1.442695, %v121_v17  ;;  %v103_v22 = vld [vmem:[#allocation8 + $0x40] sm:$0xff]  ;;  %v173_v23 = vld [vmem:[#allocation9 + $0x70] sm:$0xff]  ;;  %v94_v25 = vld [vmem:[#allocation6 + $0x78] sm:$0xff]  ;;  %s300_s14 = sshll.u32 %s521_s13, 4  ;;  %s301_s14 = int_to_ptr.vmem [resolvable:$true] %s300_s14 }
  0x39   :  { %375 = vpow2.f32 %v155_v9  ;;  %v145_v28 = vmul.f32 1.442695, %v120_v20  ;;  %v119_v29 = vmul.f32 0.5, %v103_v22  ;;  %v102_v30 = vld [vmem:[#allocation8 + $0x38] sm:$0xff]  ;;  %v93_v32 = vld [vmem:[#allocation6 + $0x70] sm:$0xff]  ;;  %v172_v34 = vld [vmem:[#allocation9 + $0x68] sm:$0xff]  ;;  %p490_p7 = scmp.lt.s32.totalorder %s301_s14, %s301_s14 }
  0x3a   :  { %377 = vpow2.f32 %v153_v12  ;;  %v118_v36 = vmul.f32 0.5, %v102_v30  ;;  %v101_v40 = vld [vmem:[#allocation8 + $0x30] sm:$0xff]  ;;  %v92_v42 = vld [vmem:[#allocation6 + $0x68] sm:$0xff]  ;;  %v171_v43 = vld [vmem:[#allocation9 + $0x60] sm:$0xff]  ;;  %s485_s15 = scalar_lea.vmem %s301_s14, 128 }
  0x3b   :  { %379 = vpow2.f32 %v151_v13  ;;  %v143_v39 = vmul.f32 1.442695, %v119_v29  ;;  %v117_v44 = vmul.f32 0.5, %v101_v40  ;;  %v100_v48 = vld [vmem:[#allocation8 + $0x28] sm:$0xff]  ;;  %v91_v50 = vld [vmem:[#allocation6 + $0x60] sm:$0xff]  ;;  %v170_v51 = vld [vmem:[#allocation9 + $0x58] sm:$0xff]  ;;  %p486_p6 = scmp.ne.s32.totalorder %s301_s14, %s485_s15  ;;  %p491_p8 = scmp.lt.s32.totalorder %s485_s15, %s485_s15 }
  0x3c   :  { %381 = vpow2.f32 %v149_v16  ;;  %v141_v47 = vmul.f32 1.442695, %v118_v36  ;;  %v116_v52 = vmul.f32 0.5, %v100_v48  ;;  %v99_v56 = vld [vmem:[#allocation8 + $0x20] sm:$0xff]  ;;  %v90_v58 = vld [vmem:[#allocation6 + $0x58] sm:$0xff]  ;;  %v169_v59 = vld [vmem:[#allocation9 + $0x50] sm:$0xff] }
  0x3d   :  { %383 = vpow2.f32 %v147_v19  ;;  %v139_v55 = vmul.f32 1.442695, %v117_v44  ;;  %v115_v60 = vmul.f32 0.5, %v99_v56  ;;  %v98_v1 = vld [vmem:[#allocation8 + $0x18] sm:$0xff]  ;;  %v89_v3 = vld [vmem:[#allocation6 + $0x50] sm:$0xff]  ;;  %v168_v4 = vld [vmem:[#allocation9 + $0x48] sm:$0xff]  ;;  %p492_p9 = por %p491_p8, %p490_p7 }
  0x3e   :  { %385 = vpow2.f32 %v145_v28  ;;  %v137_v63 = vmul.f32 1.442695, %v116_v52  ;;  %v114_v5 = vmul.f32 0.5, %v98_v1  ;;  %v97_v9 = vld [vmem:[#allocation8 + $0x10] sm:$0xff]  ;;  %v88_v11 = vld [vmem:[#allocation6 + $0x48] sm:$0xff]  ;;  %v167_v12 = vld [vmem:[#allocation9 + $0x40] sm:$0xff] }
  0x3f   :  { %387 = vpow2.f32 %v143_v39  ;;  %v135_v8 = vmul.f32 1.442695, %v115_v60  ;;  %v113_v13 = vmul.f32 0.5, %v97_v9  ;;  %v96_v17 = vld [vmem:[#allocation8 + $0x8] sm:$0xff]  ;;  %v87_v19 = vld [vmem:[#allocation6 + $0x40] sm:$0xff]  ;;  %v166_v20 = vld [vmem:[#allocation9 + $0x38] sm:$0xff]  ;;  %p493_p10 = pnand %p492_p9, %p486_p6 }
  0x40   :  { %389 = vpow2.f32 %v141_v47  ;;  %v133_v16 = vmul.f32 1.442695, %v114_v5  ;;  %v165_v28 = vld [vmem:[#allocation9 + $0x30] sm:$0xff]  ;;  %v84_v40 = vld [vmem:[#allocation6 + $0x28] sm:$0xff]  ;;  %v79_v1 = vld [vmem:[#allocation6] sm:$0xff] }
  0x41   :  { %391 = vpow2.f32 %v139_v55  ;;  %v81_v55 = vld [vmem:[#allocation6 + $0x10] sm:$0xff]  ;;  %v160_v56 = vld [vmem:[#allocation9 + $0x8] sm:$0xff] }
  0x42   :  { %393 = vpow2.f32 %v137_v63  ;;  %v80_v60 = vld [vmem:[#allocation6 + $0x8] sm:$0xff] }
  0x43   :  { %395 = vpow2.f32 %v135_v8 }
  0x44   :  { %397 = vpow2.f32 %v133_v16 }
  0x45   :  { %v374_v24 = vpop.eup %373 }
  0x46   :  { %v376_v26 = vpop.eup %375  ;;  %v190_v27 = vmul.f32 %v374_v24, %v174_v21  ;;  %v112_v21 = vmul.f32 0.5, %v96_v17  ;;  %v131_v24 = vmul.f32 1.442695, %v113_v13 }
  0x47   :  { %v378_v31 = vpop.eup %377  ;;  %v189_v33 = vmul.f32 %v376_v26, %v173_v23 }
  0x48   :  { %v206_v35 = vadd.f32 %v190_v27, %v94_v25  ;;  %v188_v38 = vmul.f32 %v378_v31, %v172_v34  ;;  %v380_v41 = vpop.eup %379  ;;  %v95_v25 = vld [vmem:[#allocation8] sm:$0xff]  ;;  %v86_v27 = vld [vmem:[#allocation6 + $0x38] sm:$0xff]  ;;  %399 = vpow2.f32 %v131_v24  ;;  %v85_v34 = vld [vmem:[#allocation6 + $0x30] sm:$0xff] }
  0x49   :  { %v205_v37 = vadd.f32 %v189_v33, %v93_v32  ;;  %v187_v46 = vmul.f32 %v380_v41, %v171_v43  ;;  %v382_v49 = vpop.eup %381  ;;  %v111_v29 = vmul.f32 0.5, %v95_v25  ;;  %v129_v32 = vmul.f32 1.442695, %v112_v21  ;;  %v163_v41 = vld [vmem:[#allocation9 + $0x20] sm:$0xff] }
  0x4a   :  { %330 = vmatpush3.xpose.msra.mxu0 %v206_v35  ;;  %v204_v45 = vadd.f32 %v188_v38, %v92_v42  ;;  %v186_v54 = vmul.f32 %v382_v49, %v170_v51  ;;  %v384_v57 = vpop.eup %383  ;;  %v164_v35 = vld [vmem:[#allocation9 + $0x28] sm:$0xff]  ;;  %v161_v51 = vld [vmem:[#allocation9 + $0x10] sm:$0xff] }
  0x4b   :  { %331 = vmatprep.subr.mxu0 %v519_v0  ;;  %v203_v53 = vadd.f32 %v187_v46, %v91_v50  ;;  %v185_v62 = vmul.f32 %v384_v57, %v169_v59  ;;  %v386_v2 = vpop.eup %385  ;;  %401 = vpow2.f32 %v129_v32  ;;  %v127_v38 = vmul.f32 1.442695, %v111_v29  ;;  %v162_v46 = vld [vmem:[#allocation9 + $0x18] sm:$0xff] }
  0x4c   :  { %v202_v61 = vadd.f32 %v186_v54, %v90_v58  ;;  %v184_v7 = vmul.f32 %v386_v2, %v168_v4  ;;  %v388_v10 = vpop.eup %387  ;;  %v82_v50 = vld [vmem:[#allocation6 + $0x18] sm:$0xff] }
  0x4d   :  { %v201_v6 = vadd.f32 %v185_v62, %v89_v3  ;;  %v183_v15 = vmul.f32 %v388_v10, %v167_v12  ;;  %v390_v18 = vpop.eup %389  ;;  %403 = vpow2.f32 %v127_v38  ;;  %v208_v3 = vld [vmem:[#allocation3] sm:$0xff] }
  0x4e   :  { %332 = vmatpush3.xpose.msra.mxu0 %v205_v37  ;;  %v200_v14 = vadd.f32 %v184_v7, %v88_v11  ;;  %v182_v23 = vmul.f32 %v390_v18, %v166_v20  ;;  %v392_v26 = vpop.eup %391  ;;  %v311_v4 = vld [vmem:[%s600_s4] ss:$0 sm:$0xff] }
  0x4f   :  { %333 = vmatprep.subr.mxu0 %v519_v0  ;;  %v199_v22 = vadd.f32 %v183_v15, %v87_v19  ;;  %v181_v31 = vmul.f32 %v392_v26, %v165_v28  ;;  %v394_v33 = vpop.eup %393 }
  0x50   :  { %v198_v30 = vadd.f32 %v182_v23, %v86_v27  ;;  %v180_v37 = vmul.f32 %v394_v33, %v164_v35  ;;  %v396_v39 = vpop.eup %395 }
  0x51   :  { %v197_v36 = vadd.f32 %v181_v31, %v85_v34  ;;  %v179_v43 = vmul.f32 %v396_v39, %v163_v41  ;;  %v398_v44 = vpop.eup %397 }
  0x52   :  { %334 = vmatpush3.xpose.msra.mxu0 %v204_v45  ;;  %v196_v42 = vadd.f32 %v180_v37, %v84_v40  ;;  %v83_v45 = vld [vmem:[#allocation6 + $0x20] sm:$0xff]  ;;  %v178_v48 = vmul.f32 %v398_v44, %v162_v46 }
  0x53   :  { %335 = vmatprep.subr.mxu0 %v519_v0  ;;  %v195_v47 = vadd.f32 %v179_v43, %v83_v45 }
  0x54   :  { %v194_v52 = vadd.f32 %v178_v48, %v82_v50 }
  0x55   :  { %v400_v49 = vpop.eup %399 }
  0x56   :  { %336 = vmatpush3.xpose.msra.mxu0 %v203_v53  ;;  %v177_v53 = vmul.f32 %v400_v49, %v161_v51 }
  0x57   :  { %337 = vmatprep.subr.mxu0 %v519_v0 }
  0x58   :  { %v402_v54 = vpop.eup %401  ;;  %v193_v57 = vadd.f32 %v177_v53, %v81_v55 }
  0x59   :  { %v176_v58 = vmul.f32 %v402_v54, %v160_v56 }
  0x5a   :  { %338 = vmatpush3.xpose.msra.mxu0 %v202_v61  ;;  %v404_v59 = vpop.eup %403  ;;  %v159_v61 = vld [vmem:[#allocation9] sm:$0xff] }
  0x5b   :  { %339 = vmatprep.subr.mxu0 %v519_v0  ;;  %v192_v62 = vadd.f32 %v176_v58, %v80_v60  ;;  %v175_v63 = vmul.f32 %v404_v59, %v159_v61 }
  0x5d   :  { %v191_v2 = vadd.f32 %v175_v63, %v79_v1 }
  0x5e   :  { %340 = vmatpush3.xpose.msra.mxu0 %v201_v6 }
  0x5f   :  { %341 = vmatprep.subr.mxu0 %v519_v0 }
  0x62   :  { %342 = vmatpush3.xpose.msra.mxu0 %v200_v14 }
  0x63   :  { %343 = vmatprep.subr.mxu0 %v519_v0 }
  0x66   :  { %344 = vmatpush3.xpose.msra.mxu0 %v199_v22 }
  0x67   :  { %345 = vmatprep.subr.mxu0 %v519_v0 }
  0x6a   :  { %346 = vmatpush3.xpose.msra.mxu0 %v198_v30 }
  0x6b   :  { %347 = vmatprep.subr.mxu0 %v519_v0 }
  0x6e   :  { %348 = vmatpush3.xpose.msra.mxu0 %v197_v36 }
  0x6f   :  { %349 = vmatprep.subr.mxu0 %v519_v0 }
  0x72   :  { %350 = vmatpush3.xpose.msra.mxu0 %v196_v42 }
  0x73   :  { %351 = vmatprep.subr.mxu0 %v519_v0 }
  0x76   :  { %352 = vmatpush3.xpose.msra.mxu0 %v195_v47 }
  0x77   :  { %353 = vmatprep.subr.mxu0 %v519_v0 }
  0x7a   :  { %354 = vmatpush3.xpose.msra.mxu0 %v194_v52 }
  0x7b   :  { %355 = vmatprep.subr.mxu0 %v519_v0 }
  0x7e   :  { %356 = vmatpush3.xpose.msra.mxu0 %v193_v57 }
  0x7f   :  { %357 = vmatprep.subr.mxu0 %v519_v0 }
  0x82   :  { %358 = vmatpush3.xpose.msra.mxu0 %v192_v62 }
  0x83   :  { %359 = vmatprep.subr.mxu0 %v519_v0 }
  0x86   :  { %360 = vmatpush3.xpose.msra.mxu0 %v191_v2 }
  0x89   :  { %362 = vmatmul.mubr.f32.vlgmr.msra.gmra.mxu0 %v208_v3 }
 0x149   :  { %v275_v5 = vpop.f32.mrf.mxu0 }
 0x14a   :  { %v292_v6 = vadd.f32 %v311_v4, %v275_v5 }
 0x14b   :  { %v363_v7 = vpop.f32.mrf.mxu0 }
 0x14c   :  { %293 = vst [vmem:[#allocation11] sm:$0xff] %v292_v6 }
 0x14d   :  { %496 = shalt.err (!%p493_p10)
}
 0x14e   :  { %303 = dma.vmem_to_hbm [thread:$0]  %s301_s14, 128, %s601_s5, [#allocation5]  }
 0x14f   :  { %511 = dma.done.wait [#allocation5], 128  }
 0x150   :  { %512 = vsyncadd [#allocation5], 4294967168 }
 0x151   :  { %307 = vsyncpa [#allocation4], 1 }
 0x152   :  { %308 = vsyncpa [#allocation7], 1 }
 0x153   :  { %309 = vsyncpa [#allocation10], 1 }
 0x154   :  { %310 = vsyncpa [#allocation5], 1 }

</bundles_post_ra>
